<compile_context>
chip_gen: v5e
topology: v5e:2x2
jax: 0.10.0
libtpu: 0.0.40
codegen_flags: <defaults>
</compile_context>

<pallas_src>
import jax
import jax.numpy as jnp
from jax.experimental import pallas as pl
from jax.experimental.pallas import tpu as pltpu


def quant_stub_forward(x):
    """QuantStub.forward before `convert` is identity -> zero-cost: return x."""
    return x


def _copy_kernel(x_ref, o_ref):
    # Identity copy.
    # TODO(synk): when this grows into the post-convert quantize path, the
    # per-block abs-max (VPU), pl.reciprocal(scale, approx=True) (EUP) and an
    # int8 store ride for free here — the copy is purely DMA/HBM bound.
    o_ref[...] = x_ref[...]


_SUBLANE_PAD = 1024        # 8 sublanes x 128 lanes (f32 vreg granule)
_MAX_LANES = 8192          # lane-dense last dim cap (unmasked vst)


def _vmem_capacity_bytes():
    try:
        return int(pltpu.get_tpu_info().vmem_capacity_bytes)
    except Exception:
        return 64 * 1024 * 1024   # conservative default: v7x per-TC VMEM


def _pick_lanes(padded_total):
    """Largest lane-dense last dim (multiple of 128) keeping >= 8 rows."""
    lanes = 128
    while (lanes * 2 <= _MAX_LANES
           and padded_total % (lanes * 2) == 0
           and padded_total // (lanes * 2) >= 8):
        lanes *= 2
    return lanes


def quant_stub_forward_pallas(x, *, alias_in_out=False):
    """Pallas copy kernel (fusion point for future observer/quantize logic)."""
    if x.size == 0:
        return x
    if alias_in_out:
        # Pure identity into a donated buffer: re-writing identical bytes
        # costs a full HBM read+write for nothing — skip the kernel entirely.
        return x

    itemsize = jnp.dtype(x.dtype).itemsize
    total = x.size

    # Flatten and pad (if needed) to a multiple of 8x128 so the kernel always
    # sees a lane-dense (rows, >=128) layout with unmasked vector stores and
    # never needs the whole array resident in a single VMEM block.
    flat = x.reshape(-1)
    pad = (-total) % _SUBLANE_PAD
    padded_total = total + pad
    if pad:
        # TODO(synk): the pad/slice round-trip adds one small extra HBM copy
        # outside the kernel; fine for the stub, revisit if the fused quantize
        # version sees many odd-sized tensors.
        flat = jnp.pad(flat, (0, pad))

    lanes = _pick_lanes(padded_total)
    rows = padded_total // lanes

    # Generation-aware block sizing: amortize the ~0.35us/grid-step overhead
    # against HBM bandwidth while leaving VMEM headroom for double buffering.
    vmem = _vmem_capacity_bytes()
    if vmem >= 96 * 1024 * 1024:          # v5e / v6e: 128 MiB physical VMEM
        target_block_bytes = 16 * 1024 * 1024
    else:                                  # v7x: 64 MiB per-TC VMEM
        target_block_bytes = 8 * 1024 * 1024

    # block_rows is a multiple of 32 sublanes (covers f32/bf16 and keeps the
    # future int8 quantized store path on unmasked vst), or the full row dim.
    sub = 32
    row_bytes = lanes * itemsize
    block_rows = max(sub, target_block_bytes // row_bytes)
    block_rows = min(block_rows, rows)
    if block_rows != rows:
        block_rows = max(sub, (block_rows // sub) * sub)

    # Guarantee >= 4 grid steps when the tensor is big enough so the single
    # "parallel" axis can shard across v7x's two TensorCores (and keep the
    # double-buffered pipeline busy on every generation).
    min_steps = 4
    if rows > sub and pl.cdiv(rows, block_rows) < min_steps:
        block_rows = max(sub, (pl.cdiv(rows, min_steps) // sub) * sub)
        block_rows = min(block_rows, rows)

    x2d = flat.reshape(rows, lanes)
    grid = (pl.cdiv(rows, block_rows),)

    block_bytes = block_rows * lanes * itemsize
    # 2 arrays x 2 pipeline buffers x block + headroom, capped below physical.
    vmem_limit = min(vmem - 8 * 1024 * 1024,
                     4 * block_bytes + 8 * 1024 * 1024)
    vmem_limit = max(vmem_limit, 4 * block_bytes)

    y2d = pl.pallas_call(
        _copy_kernel,
        out_shape=jax.ShapeDtypeStruct((rows, lanes), x.dtype),
        grid=grid,
        in_specs=[pl.BlockSpec((block_rows, lanes), lambda i: (i, 0))],
        out_specs=pl.BlockSpec((block_rows, lanes), lambda i: (i, 0)),
        compiler_params=pltpu.CompilerParams(
            dimension_semantics=("parallel",),
            vmem_limit_bytes=int(vmem_limit),
        ),
        cost_estimate=pl.CostEstimate(
            flops=0,
            transcendentals=0,
            bytes_accessed=2 * padded_total * itemsize,
        ),
    )(x2d)

    y_flat = y2d.reshape(padded_total)
    if pad:
        y_flat = y_flat[:total]
    return y_flat.reshape(x.shape)


if __name__ == "__main__":
    key = jax.random.PRNGKey(0)
    x = jax.random.normal(key, (2, 4, 16, 16), dtype=jnp.float32)

    # Fast path: what QuantStub.forward actually does pre-convert
    # (no kernel launch, no HBM round trip).
    y_fast = quant_stub_forward(x)
    assert y_fast is x

    # Aliased identity short-circuit (no pallas_call either).
    y_alias = quant_stub_forward_pallas(x, alias_in_out=True)
    assert y_alias is x

    # Pallas fusion-point path (lane-dense tiled copy kernel).
    y = quant_stub_forward_pallas(x)
    jax.block_until_ready(y)
    assert y.shape == x.shape and y.dtype == x.dtype
    assert bool(jnp.array_equal(y, x))

    # Exercise the fixed non-128-multiple path (pad -> copy -> slice).
    x_odd = jax.random.normal(jax.random.PRNGKey(1), (3, 5, 7), dtype=jnp.float32)
    y_odd = quant_stub_forward_pallas(x_odd)
    jax.block_until_ready(y_odd)
    assert y_odd.shape == x_odd.shape
    assert bool(jnp.array_equal(y_odd, x_odd))

    print("KERNEL_OK")
</pallas_src>

<mosaic_0001>
module attributes {stable_mosaic.version = 11 : i64} {
  func.func @_copy_kernel(%arg0: i32, %arg1: memref<8x256xf32, #tpu.memory_space<vmem>>, %arg2: memref<8x256xf32, #tpu.memory_space<vmem>>) attributes {dimension_semantics = [#tpu.dimension_semantics<parallel>], iteration_bounds = array<i64: 1>, scalar_prefetch = 0 : i64, scratch_operands = 0 : i64, tpu.core_type = #tpu.core_type<tc>, window_params = [{transform_indices = @transform_0, window_bounds = array<i64: 8, 256>}, {transform_indices = @transform_1, window_bounds = array<i64: 8, 256>}]} {
    %c0 = arith.constant 0 : index
    %c0_0 = arith.constant 0 : index
    %0 = vector.load %arg1[%c0, %c0_0] : memref<8x256xf32, #tpu.memory_space<vmem>>, vector<8x256xf32>
    %c0_1 = arith.constant 0 : index
    %c0_2 = arith.constant 0 : index
    %1 = vector.load %arg2[%c0_1, %c0_2] : memref<8x256xf32, #tpu.memory_space<vmem>>, vector<8x256xf32>
    tpu.vector_store %arg2[%c0_1, %c0_2], %0 {strides = array<i32>} : memref<8x256xf32, #tpu.memory_space<vmem>>, vector<8x256xf32>,
    return
  }
  func.func @transform_0(%arg0: i32) -> (i32, i32) {
    %c0_i32 = arith.constant 0 : i32
    %c0_i32_0 = arith.constant 0 : i32
    return %arg0, %c0_i32 : i32, i32
  }
  func.func @transform_1(%arg0: i32) -> (i32, i32) {
    %c0_i32 = arith.constant 0 : i32
    %c0_i32_0 = arith.constant 0 : i32
    return %arg0, %c0_i32 : i32, i32
  }
}

</mosaic_0001>

<bundles_post_ra>
// kernel: tpu_custom_call.1
= control target key start
LH: loop header
LB: loop body
LE: loop exit
PB: predicated region body
PF: predicated region fallthrough
CT: control target
= control target key end

     0   :  { %6 = vsyncpa [#allocation3], 0  ;;  %s116_s0 = inlined_call_operand.hbm [shape: f32[8,256], index: 0, kind: input, shape index: {}]   ;;  %s117_s1 = inlined_call_operand.hbm [shape: f32[8,256], index: 1, kind: output, shape index: {}]  }
   0x1   :  { %7 = vsyncpa [#allocation4], 0  ;;  %s13_s8 = sshll.u32 %s116_s0, 4  ;;  %s98_s9 = smov [#allocation2]   ;;  %s14_s8 = int_to_ptr.hbm [resolvable:$true] %s13_s8 }
   0x2   :  { %s15_s10 = sshll.u32 %s98_s9, 4  ;;  %s16_s10 = int_to_ptr.vmem [resolvable:$true] %s15_s10 }
   0x3   :  { %18 = dma.hbm_to_vmem [thread:$0]  %s14_s8, 256, %s16_s10, [#allocation3]  }
   0x4   :  { %94 = dma.done.wait [#allocation3], 256  }
   0x5   :  { %95 = vsyncadd [#allocation3], 4294967040  ;;  %s99_s11 = smov [#allocation5]   ;;  %s34_s15 = sshll.u32 %s117_s1, 4  ;;  %v23_v0 = vld [vmem:[#allocation2] sm:$0xff]  ;;  %v24_v1 = vld [vmem:[#allocation2 + $0x8] sm:$0xff]  ;;  %s35_s15 = int_to_ptr.hbm [resolvable:$true] %s34_s15 }
   0x6   :  { %s32_s12 = sshll.u32 %s99_s11, 4  ;;  %25 = vst [vmem:[#allocation5] sm:$0xff] %v23_v0  ;;  %s33_s12 = int_to_ptr.vmem [resolvable:$true] %s32_s12 }
   0x7   :  { %26 = vst [vmem:[#allocation5 + $0x8] sm:$0xff] %v24_v1 }
   0x8   :  { %37 = dma.vmem_to_hbm [thread:$0]  %s33_s12, 256, %s35_s15, [#allocation4]  }
   0x9   :  { %96 = dma.done.wait [#allocation4], 256  }
   0xa   :  { %97 = vsyncadd [#allocation4], 4294967040 }
   0xb   :  { %42 = vsyncpa [#allocation3], 1 }
   0xc   :  { %43 = vsyncpa [#allocation4], 1 }

</bundles_post_ra>
